<compile_context>
chip_gen: v6e
topology: v6e:2x2x1
jax: 0.10.0
libtpu: 0.0.40
codegen_flags: <defaults>
</compile_context>

<pallas_src>
import jax
import jax.numpy as jnp
from jax.experimental import pallas as pl

EPS = 1e-6                     # Config.epsilon
USELESS_SWITCH_FACTOR = 0.1    # Config.useless_switch_factor
LANE = 128                     # lane-pad the fused head output
PAD_NEG = -1e30                # bias for padded head columns (never wins the max)
TINY = 1e-30                   # floor for softmax denominators (NaN guard)


def _round_up(x, m):
    return (x + m - 1) // m * m


def _make_kernel(T, B, K, A):
    """Build the kernel as a closure over the static problem sizes."""
    N = T * B
    M = (T - 1) * B          # rows that have a "next step"
    KA = K * A
    ROW_GT = 2 * KA                          # Gt rows inside the packed constants
    ROW_ALANE = 2 * KA + _round_up(K, 8)     # action-index-of-lane row

    def kernel(obs_ref, fct_ref, w_ref, b_ref, sel_ref, out_ref):
        # ---- one fused MXU matmul for every head at every step (bf16 x bf16 -> f32)
        logits = (jnp.dot(obs_ref[...], w_ref[...],
                          preferred_element_type=jnp.float32)
                  + b_ref[...])                                        # (N, 128)
        # padded bias columns are -1e30 -> never win the max; exp(pad) == 0
        row_max = jnp.max(logits, axis=-1, keepdims=True)              # (N, 1)
        exps = jnp.exp(logits - row_max)                               # (N, 128)

        # ---- packed selector constants ----
        ggt = sel_ref[0:KA, :]                       # (KA, KA): 1 iff same option
        hht = sel_ref[KA:2 * KA, :]                  # (KA, KA): 1 iff same action
        gt = sel_ref[ROW_GT:ROW_GT + K, :]           # (K, KA): lane belongs to option
        a_lane = sel_ref[ROW_ALANE:ROW_ALANE + 1, :]  # (1, KA): action index of lane

        # ---- packed per-call factors ----
        is_opt = fct_ref[:, 0:K]                     # (N, K) (lane-0: feeds MXU)
        switch = fct_ref[:, K:2 * K]                 # (N, K)
        wterm = fct_ref[:M, 2 * K:3 * K]             # (M, K)
        wcont = fct_ref[:M, 3 * K:4 * K]             # (M, K)
        useless = fct_ref[:M, 4 * K:5 * K]           # (M, K)
        act = fct_ref[:, 5 * K:5 * K + 1]            # (N, 1) f32 (small ints)

        # ---- K option-policy softmaxes, vectorized over K (lane-0 aligned) ----
        pol_e = exps[:, :KA]                                           # (N, KA)
        bcast_gs = jnp.dot(pol_e, ggt,
                           preferred_element_type=jnp.float32)         # (N, KA)
        pol = pol_e / jnp.maximum(bcast_gs, TINY)                      # exact div
        le = jnp.log(pol + EPS)                                        # (N, KA)

        # ---- meta softmax over K lanes ----
        meta_e = exps[:, KA:KA + K]                                    # (N, K)
        meta = meta_e / jnp.maximum(
            jnp.sum(meta_e, axis=-1, keepdims=True), TINY)

        # ---- taken-action mask directly in K*A lanes (VPU compare, no matmul)
        mask = (a_lane == act).astype(jnp.float32)                     # (N, KA)
        # is_opt broadcast to K*A lanes (matmul off the critical dependency chain)
        is_opt_b = jnp.dot(is_opt, gt,
                           preferred_element_type=jnp.float32)         # (N, KA)

        # ---- weighted log-probability terms ----
        lp_meta = jnp.log(meta + EPS) * switch                         # (N, K)
        lp_act = mask * le * is_opt_b      # = log(a_prob+eps)*is_opt  # (N, KA)

        # termination head uses obs of step t+1 -> a B-row-shifted slice of logits
        tl = logits[B:, KA + K:KA + 2 * K]                             # (M, K)
        tp = jax.nn.sigmoid(tl)
        ulw = useless * USELESS_SWITCH_FACTOR
        lp_term = (jnp.log(tp + EPS) * (wterm - ulw)
                   + jnp.log(1.0 - tp + EPS) * (wcont + ulw))          # (M, K)

        logp_sum = (jnp.sum(lp_meta, axis=(0, 1), keepdims=True)
                    + jnp.sum(lp_act, axis=(0, 1), keepdims=True)
                    + jnp.sum(lp_term, axis=(0, 1), keepdims=True))    # (1, 1)

        # ---- pairwise KL (batchmean), algebraic O(K) form ----
        #   sum_{i!=j} B*KL_ij = (K-1)*sum p log p - sum_j p_j*(S_le - le_j)
        #                      ~= sum_j p_j * (K*le_j - S_le)   (p log p -> p*le)
        s_le = jnp.dot(le, hht, preferred_element_type=jnp.float32)    # (N, KA)
        kl_sum = jnp.sum(pol * (K * le - s_le),
                         axis=(0, 1), keepdims=True)                   # (1, 1)

        out_ref[:, 0:1] = logp_sum
        out_ref[:, 1:2] = kl_sum

    return kernel


def prepare_ddo_heads(Wm, bm, Wp, bp, Wt, bt, mxu_dtype=jnp.bfloat16):
    """Fuse the agent heads into one lane-padded weight/bias and build the
    constant selector matrices.  Call once per weight update (hoisted out of
    the per-loss-call path)."""
    D, K = Wm.shape
    A = Wp.shape[2]
    KA = K * A
    C = KA + 2 * K
    CP = _round_up(C, LANE)

    # fused columns: [policies(K*A) | meta(K) | term(K) | pad]
    W = jnp.zeros((D, CP), jnp.float32)
    W = W.at[:, :KA].set(jnp.transpose(Wp, (1, 0, 2)).reshape(D, KA))
    W = W.at[:, KA:KA + K].set(Wm)
    W = W.at[:, KA + K:C].set(Wt.T)

    b = jnp.full((1, CP), PAD_NEG, jnp.float32)   # pad bias never wins the row max
    b = b.at[0, :KA].set(bp[:, 0, :].reshape(KA))
    b = b.at[0, KA:KA + K].set(bm[0])
    b = b.at[0, KA + K:C].set(bt[:, 0])

    # selector constants packed into one array (all section offsets 8-aligned)
    G = jnp.repeat(jnp.eye(K, dtype=jnp.float32), A, axis=0)           # (KA, K)
    H = jnp.tile(jnp.eye(A, dtype=jnp.float32), (K, 1))                # (KA, A)
    row_gt = 2 * KA
    row_alane = 2 * KA + _round_up(K, 8)
    sel = jnp.zeros((row_alane + 1, KA), jnp.float32)
    sel = sel.at[0:KA].set(G @ G.T)                    # 1 iff same option group
    sel = sel.at[KA:2 * KA].set(H @ H.T)               # 1 iff same action index
    sel = sel.at[row_gt:row_gt + K].set(G.T)           # option -> K*A lane broadcast
    sel = sel.at[row_alane].set(jnp.tile(jnp.arange(A, dtype=jnp.float32), K))

    return W.astype(mxu_dtype), b, sel


def ddo_loss_pallas(obs, actions, is_opt, switch_to, will_cont, will_term,
                    useless_next, W_fused, b_fused, sel):
    T, B, D = obs.shape
    K = is_opt.shape[-1]
    A = sel.shape[-1] // K
    N = T * B

    # one packed per-call tensor: [is_opt | switch | will_term | will_cont | useless | action]
    factors = jnp.concatenate(
        [is_opt.reshape(N, K), switch_to.reshape(N, K),
         will_term.reshape(N, K), will_cont.reshape(N, K),
         useless_next.reshape(N, K),
         actions.reshape(N, 1).astype(jnp.float32)], axis=1)

    obs2 = obs.reshape(N, D).astype(W_fused.dtype)

    # Whole problem fits in VMEM -> single grid-less invocation (5 input DMAs,
    # one (1,2) output).  Add a leading "parallel" grid axis only if several
    # independent loss instances are batched (second v7x TensorCore).
    out = pl.pallas_call(
        _make_kernel(T, B, K, A),
        out_shape=jax.ShapeDtypeStruct((1, 2), jnp.float32),
    )(obs2, factors, W_fused, b_fused, sel)

    n_logp_elems = B * K * (2 * T + 2 * (T - 1))
    loss_logprob = -out[0, 0] / n_logp_elems
    loss_kl = -out[0, 1] / (T * B * K * (K - 1))
    return loss_logprob, loss_kl


def ddo_loss_reference(obs, actions, is_opt, switch_to, will_cont, will_term,
                       useless_next, Wm, bm, Wp, bp, Wt, bt):
    """Pure-JAX mirror of the PyTorch forward, for verification."""
    T, B, _D = obs.shape
    K = Wm.shape[1]
    logprobs, kls = [], []
    for t in range(T):
        o = obs[t]
        meta = jax.nn.softmax(o @ Wm + bm, axis=-1)
        pols = []
        for k in range(K):
            pol = jax.nn.softmax(o @ Wp[k] + bp[k], axis=-1)
            pols.append(pol)
            a_prob = pol[jnp.arange(B), actions[t]]
            logprobs.append(jnp.log(meta[:, k] + EPS) * switch_to[t, :, k])
            logprobs.append(jnp.log(a_prob + EPS) * is_opt[t, :, k])
            if t < T - 1:
                no = obs[t + 1]
                term = jax.nn.sigmoid(no @ Wt[k] + bt[k, 0])
                ulw = useless_next[t, :, k] * USELESS_SWITCH_FACTOR
                logprobs.append(jnp.log(term + EPS) * (will_term[t, :, k] - ulw))
                logprobs.append(jnp.log(1.0 - term + EPS) * (will_cont[t, :, k] + ulw))
        divs = []
        for i in range(K):
            for j in range(K):
                if i != j:
                    pj = pols[j]
                    plogp = jnp.where(pj > 0, pj * jnp.log(pj), 0.0)  # xlogy
                    divs.append(jnp.sum(plogp - pj * jnp.log(pols[i] + EPS)) / B)
        kls.append(jnp.mean(jnp.stack(divs)))
    return -jnp.mean(jnp.concatenate(logprobs)), -jnp.mean(jnp.stack(kls))


if __name__ == "__main__":
    T, B, D, K, A = 6, 8, 32, 4, 8   # steps, batch, features, noptions, nactions
    key = jax.random.PRNGKey(0)
    ks = jax.random.split(key, 13)

    obs = jax.random.normal(ks[0], (T, B, D), jnp.float32)
    actions = jax.random.randint(ks[1], (T, B), 0, A)
    # TODO(synk): ForwardBackward factors come from a forward-backward recursion
    # that is not part of the given module; synthesized here as random tensors.
    is_opt = jax.random.uniform(ks[2], (T, B, K), jnp.float32)
    switch_to = jax.random.uniform(ks[3], (T, B, K), jnp.float32)
    will_cont = jax.random.uniform(ks[4], (T, B, K), jnp.float32)
    will_term = jax.random.uniform(ks[5], (T, B, K), jnp.float32)
    useless_next = jax.random.uniform(ks[6], (T, B, K), jnp.float32)

    # deterministic synthetic agent heads (meta / per-option policy / termination)
    Wm = jax.random.normal(ks[7], (D, K), jnp.float32) / jnp.sqrt(D)
    bm = jax.random.normal(ks[8], (1, K), jnp.float32) * 0.1
    Wp = jax.random.normal(ks[9], (K, D, A), jnp.float32) / jnp.sqrt(D)
    bp = jax.random.normal(ks[10], (K, 1, A), jnp.float32) * 0.1
    Wt = jax.random.normal(ks[11], (K, D), jnp.float32) / jnp.sqrt(D)
    bt = jax.random.normal(ks[12], (K, 1), jnp.float32) * 0.1

    ref = ddo_loss_reference(obs, actions, is_opt, switch_to, will_cont,
                             will_term, useless_next, Wm, bm, Wp, bp, Wt, bt)

    loss_fn = jax.jit(ddo_loss_pallas)

    # f32 MXU operands: bit-faithful to the module's math -> tight tolerance.
    heads_f32 = prepare_ddo_heads(Wm, bm, Wp, bp, Wt, bt, mxu_dtype=jnp.float32)
    out_f32 = jax.block_until_ready(
        loss_fn(obs, actions, is_opt, switch_to, will_cont, will_term,
                useless_next, *heads_f32))
    assert jnp.allclose(out_f32[0], ref[0], rtol=5e-3, atol=5e-4), (out_f32[0], ref[0])
    assert jnp.allclose(out_f32[1], ref[1], rtol=5e-3, atol=5e-4), (out_f32[1], ref[1])

    # bf16 MXU operands (default fast path on v5e/v6e/v7x); elementwise math is
    # still f32, so only the fused head matmul differs from the f32 reference.
    heads_bf16 = prepare_ddo_heads(Wm, bm, Wp, bp, Wt, bt, mxu_dtype=jnp.bfloat16)
    out_bf16 = jax.block_until_ready(
        loss_fn(obs, actions, is_opt, switch_to, will_cont, will_term,
                useless_next, *heads_bf16))
    assert jnp.allclose(out_bf16[0], ref[0], rtol=3e-2, atol=5e-3), (out_bf16[0], ref[0])
    assert jnp.allclose(out_bf16[1], ref[1], rtol=3e-2, atol=5e-3), (out_bf16[1], ref[1])

    print("KERNEL_OK")
</pallas_src>

<mosaic_0001>
module attributes {stable_mosaic.version = 11 : i64} {
  func.func @kernel(%arg0: memref<48x32xf32, #tpu.memory_space<vmem>>, %arg1: memref<48x21xf32, #tpu.memory_space<vmem>>, %arg2: memref<32x128xf32, #tpu.memory_space<vmem>>, %arg3: memref<1x128xf32, #tpu.memory_space<vmem>>, %arg4: memref<73x32xf32, #tpu.memory_space<vmem>>, %arg5: memref<1x2xf32, #tpu.memory_space<vmem>>) attributes {dimension_semantics = [], scalar_prefetch = 0 : i64, scratch_operands = 0 : i64, tpu.core_type = #tpu.core_type<tc>} {
    %c0 = arith.constant 0 : index
    %c0_0 = arith.constant 0 : index
    %0 = vector.load %arg0[%c0, %c0_0] : memref<48x32xf32, #tpu.memory_space<vmem>>, vector<48x32xf32>
    %c0_1 = arith.constant 0 : index
    %c0_2 = arith.constant 0 : index
    %1 = vector.load %arg2[%c0_1, %c0_2] : memref<32x128xf32, #tpu.memory_space<vmem>>, vector<32x128xf32>
    %cst = arith.constant dense<0.000000e+00> : vector<48x128xf32>
    %2 = tpu.matmul %0, %1, %cst {dimension_numbers = #tpu.dot_dimension_numbers<[1], [0], [0], [1], [0, 0, 1, 1], [], []>} : vector<48x32xf32>, vector<32x128xf32>, vector<48x128xf32> -> vector<48x128xf32>
    %c0_3 = arith.constant 0 : index
    %c0_4 = arith.constant 0 : index
    %3 = vector.load %arg3[%c0_3, %c0_4] : memref<1x128xf32, #tpu.memory_space<vmem>>, vector<1x128xf32>
    %4 = vector.broadcast %3 : vector<1x128xf32> to vector<48x128xf32>
    %5 = arith.addf %2, %4 : vector<48x128xf32>
    %cst_5 = arith.constant dense<0xFF800000> : vector<48xf32>
    %6 = vector.multi_reduction <maximumf>, %5, %cst_5 [1] : vector<48x128xf32> to vector<48xf32>
    %7 = vector.shape_cast %6 : vector<48xf32> to vector<48x1xf32>
    %8 = vector.broadcast %7 : vector<48x1xf32> to vector<48x128xf32>
    %9 = arith.subf %5, %8 : vector<48x128xf32>
    %10 = math.exp %9 : vector<48x128xf32>
    %c0_6 = arith.constant 0 : index
    %c0_7 = arith.constant 0 : index
    %11 = vector.load %arg4[%c0_6, %c0_7] : memref<73x32xf32, #tpu.memory_space<vmem>>, vector<32x32xf32>
    %c32 = arith.constant 32 : index
    %c0_8 = arith.constant 0 : index
    %12 = vector.load %arg4[%c32, %c0_8] : memref<73x32xf32, #tpu.memory_space<vmem>>, vector<32x32xf32>
    %c64 = arith.constant 64 : index
    %c0_9 = arith.constant 0 : index
    %13 = vector.load %arg4[%c64, %c0_9] : memref<73x32xf32, #tpu.memory_space<vmem>>, vector<4x32xf32>
    %c72 = arith.constant 72 : index
    %c0_10 = arith.constant 0 : index
    %14 = vector.load %arg4[%c72, %c0_10] : memref<73x32xf32, #tpu.memory_space<vmem>>, vector<1x32xf32>
    %c0_11 = arith.constant 0 : index
    %c0_12 = arith.constant 0 : index
    %15 = vector.load %arg1[%c0_11, %c0_12] : memref<48x21xf32, #tpu.memory_space<vmem>>, vector<48x4xf32>
    %c0_13 = arith.constant 0 : index
    %c4 = arith.constant 4 : index
    %16 = vector.load %arg1[%c0_13, %c4] : memref<48x21xf32, #tpu.memory_space<vmem>>, vector<48x4xf32>
    %c0_14 = arith.constant 0 : index
    %c8 = arith.constant 8 : index
    %17 = vector.load %arg1[%c0_14, %c8] : memref<48x21xf32, #tpu.memory_space<vmem>>, vector<40x4xf32>
    %c0_15 = arith.constant 0 : index
    %c12 = arith.constant 12 : index
    %18 = vector.load %arg1[%c0_15, %c12] : memref<48x21xf32, #tpu.memory_space<vmem>>, vector<40x4xf32>
    %c0_16 = arith.constant 0 : index
    %c16 = arith.constant 16 : index
    %19 = vector.load %arg1[%c0_16, %c16] : memref<48x21xf32, #tpu.memory_space<vmem>>, vector<40x4xf32>
    %c0_17 = arith.constant 0 : index
    %c20 = arith.constant 20 : index
    %20 = vector.load %arg1[%c0_17, %c20] : memref<48x21xf32, #tpu.memory_space<vmem>>, vector<48x1xf32>
    %21 = vector.extract_strided_slice %10 {offsets = [0, 0], sizes = [48, 32], strides = [1, 1]} : vector<48x128xf32> to vector<48x32xf32>
    %cst_18 = arith.constant dense<0.000000e+00> : vector<48x32xf32>
    %22 = tpu.matmul %21, %11, %cst_18 {dimension_numbers = #tpu.dot_dimension_numbers<[1], [0], [0], [1], [0, 0, 1, 1], [], []>} : vector<48x32xf32>, vector<32x32xf32>, vector<48x32xf32> -> vector<48x32xf32>
    %cst_19 = arith.constant 1.000000e-30 : f32
    %23 = vector.broadcast %cst_19 : f32 to vector<48x32xf32>
    %24 = arith.maximumf %22, %23 : vector<48x32xf32>
    %25 = arith.divf %21, %24 : vector<48x32xf32>
    %cst_20 = arith.constant 9.99999997E-7 : f32
    %26 = vector.broadcast %cst_20 : f32 to vector<48x32xf32>
    %27 = arith.addf %25, %26 : vector<48x32xf32>
    %28 = math.log %27 : vector<48x32xf32>
    %29 = vector.extract_strided_slice %10 {offsets = [0, 32], sizes = [48, 4], strides = [1, 1]} : vector<48x128xf32> to vector<48x4xf32>
    %cst_21 = arith.constant dense<0.000000e+00> : vector<48xf32>
    %30 = vector.multi_reduction <add>, %29, %cst_21 [1] : vector<48x4xf32> to vector<48xf32>
    %31 = vector.shape_cast %30 : vector<48xf32> to vector<48x1xf32>
    %cst_22 = arith.constant 1.000000e-30 : f32
    %32 = vector.broadcast %cst_22 : f32 to vector<48x1xf32>
    %33 = arith.maximumf %31, %32 : vector<48x1xf32>
    %34 = vector.broadcast %33 : vector<48x1xf32> to vector<48x4xf32>
    %35 = arith.divf %29, %34 : vector<48x4xf32>
    %36 = vector.broadcast %14 : vector<1x32xf32> to vector<48x32xf32>
    %37 = vector.broadcast %20 : vector<48x1xf32> to vector<48x32xf32>
    %38 = arith.cmpf oeq, %36, %37 : vector<48x32xf32>
    %39 = arith.extui %38 : vector<48x32xi1> to vector<48x32xi32>
    %40 = arith.sitofp %39 : vector<48x32xi32> to vector<48x32xf32>
    %cst_23 = arith.constant dense<0.000000e+00> : vector<48x32xf32>
    %41 = tpu.matmul %15, %13, %cst_23 {dimension_numbers = #tpu.dot_dimension_numbers<[1], [0], [0], [1], [0, 0, 1, 1], [], []>} : vector<48x4xf32>, vector<4x32xf32>, vector<48x32xf32> -> vector<48x32xf32>
    %cst_24 = arith.constant 9.99999997E-7 : f32
    %42 = vector.broadcast %cst_24 : f32 to vector<48x4xf32>
    %43 = arith.addf %35, %42 : vector<48x4xf32>
    %44 = math.log %43 : vector<48x4xf32>
    %45 = arith.mulf %44, %16 : vector<48x4xf32>
    %46 = arith.mulf %40, %28 : vector<48x32xf32>
    %47 = arith.mulf %46, %41 : vector<48x32xf32>
    %48 = vector.extract_strided_slice %5 {offsets = [8, 36], sizes = [40, 4], strides = [1, 1]} : vector<48x128xf32> to vector<40x4xf32>
    %49 = arith.negf %48 : vector<40x4xf32>
    %50 = math.exp %49 : vector<40x4xf32>
    %cst_25 = arith.constant 1.000000e+00 : f32
    %51 = vector.broadcast %cst_25 : f32 to vector<40x4xf32>
    %52 = arith.addf %51, %50 : vector<40x4xf32>
    %53 = arith.divf %51, %52 : vector<40x4xf32>
    %cst_26 = arith.constant 1.000000e-01 : f32
    %54 = vector.broadcast %cst_26 : f32 to vector<40x4xf32>
    %55 = arith.mulf %19, %54 : vector<40x4xf32>
    %cst_27 = arith.constant 9.99999997E-7 : f32
    %56 = vector.broadcast %cst_27 : f32 to vector<40x4xf32>
    %57 = arith.addf %53, %56 : vector<40x4xf32>
    %58 = math.log %57 : vector<40x4xf32>
    %59 = arith.subf %17, %55 : vector<40x4xf32>
    %60 = arith.mulf %58, %59 : vector<40x4xf32>
    %cst_28 = arith.constant 1.000000e+00 : f32
    %61 = vector.broadcast %cst_28 : f32 to vector<40x4xf32>
    %62 = arith.subf %61, %53 : vector<40x4xf32>
    %cst_29 = arith.constant 9.99999997E-7 : f32
    %63 = vector.broadcast %cst_29 : f32 to vector<40x4xf32>
    %64 = arith.addf %62, %63 : vector<40x4xf32>
    %65 = math.log %64 : vector<40x4xf32>
    %66 = arith.addf %18, %55 : vector<40x4xf32>
    %67 = arith.mulf %65, %66 : vector<40x4xf32>
    %68 = arith.addf %60, %67 : vector<40x4xf32>
    %69 = vector.shape_cast %45 : vector<48x4xf32> to vector<1x48x4xf32>
    %cst_30 = arith.constant dense<0.000000e+00> : vector<1xf32>
    %70 = vector.multi_reduction <add>, %69, %cst_30 [1, 2] : vector<1x48x4xf32> to vector<1xf32>
    %71 = vector.shape_cast %70 : vector<1xf32> to vector<1x1x1xf32>
    %72 = vector.extract %71[0, 0, 0] : f32 from vector<1x1x1xf32>
    %73 = vector.broadcast %72 : f32 to vector<1x1xf32>
    %74 = vector.shape_cast %47 : vector<48x32xf32> to vector<1x48x32xf32>
    %cst_31 = arith.constant dense<0.000000e+00> : vector<1xf32>
    %75 = vector.multi_reduction <add>, %74, %cst_31 [1, 2] : vector<1x48x32xf32> to vector<1xf32>
    %76 = vector.shape_cast %75 : vector<1xf32> to vector<1x1x1xf32>
    %77 = vector.extract %76[0, 0, 0] : f32 from vector<1x1x1xf32>
    %78 = vector.broadcast %77 : f32 to vector<1x1xf32>
    %79 = arith.addf %73, %78 : vector<1x1xf32>
    %80 = vector.shape_cast %68 : vector<40x4xf32> to vector<1x40x4xf32>
    %cst_32 = arith.constant dense<0.000000e+00> : vector<1xf32>
    %81 = vector.multi_reduction <add>, %80, %cst_32 [1, 2] : vector<1x40x4xf32> to vector<1xf32>
    %82 = vector.shape_cast %81 : vector<1xf32> to vector<1x1x1xf32>
    %83 = vector.extract %82[0, 0, 0] : f32 from vector<1x1x1xf32>
    %84 = vector.broadcast %83 : f32 to vector<1x1xf32>
    %85 = arith.addf %79, %84 : vector<1x1xf32>
    %cst_33 = arith.constant dense<0.000000e+00> : vector<48x32xf32>
    %86 = tpu.matmul %28, %12, %cst_33 {dimension_numbers = #tpu.dot_dimension_numbers<[1], [0], [0], [1], [0, 0, 1, 1], [], []>} : vector<48x32xf32>, vector<32x32xf32>, vector<48x32xf32> -> vector<48x32xf32>
    %cst_34 = arith.constant 4.000000e+00 : f32
    %87 = vector.broadcast %cst_34 : f32 to vector<48x32xf32>
    %88 = arith.mulf %87, %28 : vector<48x32xf32>
    %89 = arith.subf %88, %86 : vector<48x32xf32>
    %90 = arith.mulf %25, %89 : vector<48x32xf32>
    %91 = vector.shape_cast %90 : vector<48x32xf32> to vector<1x48x32xf32>
    %cst_35 = arith.constant dense<0.000000e+00> : vector<1xf32>
    %92 = vector.multi_reduction <add>, %91, %cst_35 [1, 2] : vector<1x48x32xf32> to vector<1xf32>
    %93 = vector.shape_cast %92 : vector<1xf32> to vector<1x1x1xf32>
    %94 = vector.extract %93[0, 0, 0] : f32 from vector<1x1x1xf32>
    %95 = vector.broadcast %94 : f32 to vector<1x1xf32>
    %c0_36 = arith.constant 0 : index
    %c0_37 = arith.constant 0 : index
    %96 = vector.load %arg5[%c0_36, %c0_37] : memref<1x2xf32, #tpu.memory_space<vmem>>, vector<1x1xf32>
    tpu.vector_store %arg5[%c0_36, %c0_37], %85 {strides = array<i32>} : memref<1x2xf32, #tpu.memory_space<vmem>>, vector<1x1xf32>,
    %c0_38 = arith.constant 0 : index
    %c1 = arith.constant 1 : index
    %97 = vector.load %arg5[%c0_38, %c1] : memref<1x2xf32, #tpu.memory_space<vmem>>, vector<1x1xf32>
    tpu.vector_store %arg5[%c0_38, %c1], %95 {strides = array<i32>} : memref<1x2xf32, #tpu.memory_space<vmem>>, vector<1x1xf32>,
    return
  }
}

</mosaic_0001>

<bundles_post_ra>
// kernel: ddo_loss_pallas.1
= control target key start
LH: loop header
LB: loop body
LE: loop exit
PB: predicated region body
PF: predicated region fallthrough
CT: control target
= control target key end

     0   :  { %vm37_vm0 = vcmask 261120   ;;  %vm465_vm1 = vcmask 1043456   ;;  %vm364_vm2 = vcmask 31744   ;;  %s1312_s9 = smov 124   ;;  %s1313_s10 = smov 28   ;;  %v1314_v63 = vmov 20   ;;  %s1690_s2 = inlined_call_operand.vmem [shape: f32[32,128], index: 2, kind: input, shape index: {}]   ;;  %s1691_s0 = inlined_call_operand.vmem [shape: f32[48,32], index: 0, kind: input, shape index: {}]   ;;  %s1692_s3 = inlined_call_operand.vmem [shape: f32[1,128], index: 3, kind: input, shape index: {}]   ;;  %s1693_s4 = inlined_call_operand.vmem [shape: f32[73,32], index: 4, kind: input, shape index: {}]   ;;  %s1694_s1 = inlined_call_operand.vmem [shape: f32[48,21], index: 1, kind: input, shape index: {}]   ;;  %s1695_s5 = inlined_call_operand.vmem [shape: f32[1,2], index: 5, kind: output, shape index: {}]  }
   0x1   :  { %v29_v0 = vld [vmem:[%s1690_s2 + $0x18] sm:$0xff]  ;;  %v28_v1 = vld [vmem:[%s1690_s2 + $0x10] sm:$0xff]  ;;  %v20_v2 = vld [vmem:[%s1691_s0] sm:$0xff]  ;;  %1208 = vset.pattern.permute.xlu0 %v1314_v63  ;;  %1209 = vset.pattern.permute.xlu1 %v1314_v63  ;;  %s1315_s17 = smov 24   ;;  %s1316_s18 = smov 92   ;;  %vm1047_vm9 = vcmask 0  }
   0x2   :  { %1130 = vmatprep.subr.mxu0 %v29_v0  ;;  %v27_v3 = vld [vmem:[%s1690_s2 + $0x8] sm:$0xff]  ;;  %1138 = vmatprep.mubr.msk.f32.mxu0 %vm37_vm0, %v20_v2  ;;  %v26_v4 = vld [vmem:[%s1690_s2] sm:$0xff]  ;;  %v22_v6 = vld [vmem:[%s1691_s0 + $0x10] sm:$0xff]  ;;  %s1310_s2 = smov 96   ;;  %vm1049_vm10 = vcmask 8200  }
   0x3   :  { %1131 = vmatpush3.msra.mxu0 %v29_v0  ;;  %v21_v5 = vld [vmem:[%s1691_s0 + $0x8] sm:$0xff]  ;;  %v23_v7 = vld [vmem:[%s1691_s0 + $0x18] sm:$0xff]  ;;  %v24_v8 = vld [vmem:[%s1691_s0 + $0x20] sm:$0xff] }
   0x4   :  { %1132 = vmatprep.subr.mxu0 %v28_v1  ;;  %v25_v9 = vld [vmem:[%s1691_s0 + $0x28] sm:$0xff]  ;;  %v1055_v11 = vld [vmem:[%s1692_s3] ss:$0 sm:$0xff]  ;;  %v184_v23 = vld [vmem:[%s1693_s4 + $0x18] sm:$0xff] }
   0x5   :  { %1133 = vmatpush3.msra.mxu0 %v28_v1  ;;  %1147 = vmatprep.subr.mxu1 %v184_v23  ;;  %v183_v24 = vld [vmem:[%s1693_s4 + $0x10] sm:$0xff]  ;;  %v182_v25 = vld [vmem:[%s1693_s4 + $0x8] sm:$0xff]  ;;  %v181_v26 = vld [vmem:[%s1693_s4] sm:$0xff] }
   0x6   :  { %1134 = vmatprep.subr.mxu0 %v27_v3  ;;  %1148 = vmatpush3.msra.mxu1 %v184_v23  ;;  %v1417_v27 = vld [vmem:[%s1694_s1] sm:$0xff]  ;;  %v1427_v29 = vld [vmem:[%s1694_s1 + $0x8] sm:$0xff]  ;;  %v1432_v30 = vld [vmem:[%s1694_s1 + $0x10] sm:$0xff] }
   0x7   :  { %1135 = vmatpush3.msra.mxu0 %v27_v3  ;;  %1149 = vmatprep.subr.mxu1 %v183_v24  ;;  %v189_v28 = vld [vmem:[%s1693_s4 + $0x40] sm:$0xf]  ;;  %v1441_v31 = vld [vmem:[%s1694_s1 + $0x18] sm:$0xff]  ;;  %v1459_v46 = vld [vmem:[%s1694_s1 + $0x28] sm:$0xff]  ;;  %v648_v57 = vmul.f32 0.1, %v1417_v27 }
   0x8   :  { %1136 = vmatprep.subr.mxu0 %v26_v4  ;;  %1150 = vmatpush3.msra.mxu1 %v183_v24  ;;  %v1446_v32 = vld [vmem:[%s1694_s1 + $0x20] sm:$0xff]  ;;  %s1311_s1 = smov 120   ;;  %v649_v59 = vmul.f32 0.1, %v1427_v29  ;;  %v650_v60 = vmul.f32 0.1, %v1432_v30 }
   0x9   :  { %1137 = vmatpush3.msra.mxu0 %v26_v4  ;;  %1151 = vmatprep.subr.mxu1 %v182_v25  ;;  %v651_v61 = vmul.f32 0.1, %v1441_v31  ;;  %v652_v62 = vmul.f32 0.1, %v1446_v32  ;;  %v188_v0 = vld [vmem:[%s1693_s4 + $0x38] sm:$0xff]  ;;  %v187_v1 = vld [vmem:[%s1693_s4 + $0x30] sm:$0xff] }
   0xa   :  { %1139 = vmatmul.mubr.msk.f32.vlgmr.msra.gmra.mxu0 %vm37_vm0, %v21_v5  ;;  %1152 = vmatpush3.msra.mxu1 %v182_v25  ;;  %v186_v2 = vld [vmem:[%s1693_s4 + $0x28] sm:$0xff]  ;;  %v185_v3 = vld [vmem:[%s1693_s4 + $0x20] sm:$0xff] }
   0xb   :  { %1141 = vmatprep.mubr.msk.f32.mxu0 %vm37_vm0, %v22_v6  ;;  %1153 = vmatprep.subr.mxu1 %v181_v26 }
   0xc   :  { %1154 = vmatpush3.msra.mxu1 %v181_v26  ;;  %1164 = vmatprep.subr.msk.mxu0 %vm465_vm1, %v189_v28 }
   0xd   :  { %1165 = vmatpush3.msk.msra.mxu0 %vm465_vm1, %v189_v28  ;;  %1175 = vmatprep.subr.mxu1 %v188_v0 }
   0xe   :  { %1142 = vmatmul.mubr.msk.f32.gmra.mxu0 %vm37_vm0, %v23_v7 }
   0xf   :  { %1144 = vmatprep.mubr.msk.f32.mxu0 %vm37_vm0, %v24_v8 }
  0x12   :  { %1145 = vmatmul.mubr.msk.f32.gmra.mxu0 %vm37_vm0, %v25_v9 }
  0x13   :  { %1166 = vmatprep.mubr.msk.f32.mxu0 %vm364_vm2, %v1417_v27 }
  0x16   :  { %1167 = vmatmul.mubr.msk.f32.vlgmr.msra.gmra.mxu0 %vm364_vm2, %v1427_v29 }
  0x17   :  { %1169 = vmatprep.mubr.msk.f32.mxu0 %vm364_vm2, %v1432_v30 }
  0x1a   :  { %1170 = vmatmul.mubr.msk.f32.gmra.mxu0 %vm364_vm2, %v1441_v31 }
  0x1b   :  { %1172 = vmatprep.mubr.msk.f32.mxu0 %vm364_vm2, %v1446_v32 }
  0x1e   :  { %1173 = vmatmul.mubr.msk.f32.gmra.mxu0 %vm364_vm2, %v1459_v46 }
  0xca   :  { %v1140_v10 = vpop.f32.mrf.mxu0 }
  0xcb   :  { %v1387_v16 = vadd.f32 %v1140_v10, %v1055_v11 }
  0xcc   :  { %v122_v12 = vpop.f32.mrf.mxu0 }
  0xcd   :  { %v123_v13 = vadd.f32 %v1055_v11, %v122_v12 }
  0xce   :  { %v1143_v14 = vpop.f32.mrf.mxu0 }
  0xcf   :  { %151 = vmax.xlane.f32.xlu0 %v123_v13  ;;  %v1393_v20 = vadd.f32 %v1143_v14, %v1055_v11 }
  0xd0   :  { %v132_v15 = vpop.f32.mrf.mxu0 }
  0xd1   :  { %v1389_v17 = vadd.f32 %v1055_v11, %v132_v15 }
  0xd2   :  { %v1146_v18 = vpop.f32.mrf.mxu0 }
  0xd3   :  { %155 = vmax.xlane.f32.xlu1 %v1389_v17  ;;  %153 = vmax.xlane.f32.xlu0 %v1387_v16  ;;  %v1399_v22 = vadd.f32 %v1146_v18, %v1055_v11 }
  0xd4   :  { %v142_v19 = vpop.f32.mrf.mxu0 }
  0xd5   :  { %v1395_v21 = vadd.f32 %v1055_v11, %v142_v19 }
  0xd7   :  { %157 = vmax.xlane.f32.xlu1 %v1393_v20  ;;  %159 = vmax.xlane.f32.xlu0 %v1395_v21 }
  0xdb   :  { %161 = vmax.xlane.f32.xlu1 %v1399_v22 }
 0x158   :  { %v152_v33 = vpop.xlane.xlu0 %151 }
 0x159   :  { %v163_v34 = vsub.f32 %v123_v13, %v152_v33 }
 0x15b   :  { %v169_v35 = vmul.f32 1.442695, %v163_v34 }
 0x15c   :  { %v156_v36 = vpop.xlane.xlu1 %155  ;;  %v154_v37 = vpop.xlane.xlu0 %153 }
 0x15d   :  { %1210 = vpow2.f32 %v169_v35  ;;  %v165_v38 = vsub.f32 %v1389_v17, %v156_v36  ;;  %v164_v39 = vsub.f32 %v1387_v16, %v154_v37 }
 0x15f   :  { %v173_v40 = vmul.f32 1.442695, %v165_v38  ;;  %v171_v41 = vmul.f32 1.442695, %v164_v39 }
 0x160   :  { %v158_v42 = vpop.xlane.xlu1 %157  ;;  %v160_v43 = vpop.xlane.xlu0 %159 }
 0x161   :  { %1212 = vpow2.f32 %v173_v40  ;;  %v166_v44 = vsub.f32 %v1393_v20, %v158_v42  ;;  %v167_v45 = vsub.f32 %v1395_v21, %v160_v43 }
 0x162   :  { %1214 = vpow2.f32 %v171_v41 }
 0x163   :  { %v175_v47 = vmul.f32 1.442695, %v166_v44  ;;  %v177_v48 = vmul.f32 1.442695, %v167_v45 }
 0x164   :  { %v162_v49 = vpop.xlane.xlu1 %161 }
 0x165   :  { %1216 = vpow2.f32 %v175_v47  ;;  %v168_v50 = vsub.f32 %v1399_v22, %v162_v49 }
 0x166   :  { %1218 = vpow2.f32 %v177_v48 }
 0x167   :  { %v179_v51 = vmul.f32 1.442695, %v168_v50 }
 0x169   :  { %1220 = vpow2.f32 %v179_v51 }
 0x16a   :  { %v1464_v52 = vpop.eup %1210 }
 0x16b   :  { %346 = vrot.lane.b32.xlu0 %v1464_v52, %s1310_s2  ;;  %1155 = vmatprep.mubr.msk.f32.mxu1 %vm37_vm0, %v1464_v52 }
 0x16e   :  { %v1470_v53 = vpop.eup %1212 }
 0x16f   :  { %v1472_v54 = vpop.eup %1214 }
 0x170   :  { %348 = vrot.lane.b32.xlu1 %v1472_v54, %s1310_s2  ;;  %1156 = vmatmul.mubr.msk.f32.vlgmr.msra.gmra.mxu1 %vm37_vm0, %v1472_v54 }
 0x171   :  { %1158 = vmatprep.mubr.msk.f32.mxu1 %vm37_vm0, %v1470_v53  ;;  %1176 = vmatpush3.msra.mxu1 %v188_v0  ;;  %v1083_v0 = vmul.f32 -1.442695, %v1389_v17 }
 0x172   :  { %v1480_v55 = vpop.eup %1216  ;;  %1177 = vmatprep.subr.mxu1 %v187_v1 }
 0x173   :  { %v1482_v56 = vpop.eup %1218  ;;  %1178 = vmatpush3.msra.mxu1 %v187_v1 }
 0x174   :  { %352 = vrot.lane.b32.xlu1 %v1480_v55, %s1310_s2  ;;  %1159 = vmatmul.mubr.msk.f32.gmra.mxu1 %vm37_vm0, %v1480_v55 }
 0x175   :  { %354 = vrot.lane.b32.xlu0 %v1482_v56, %s1310_s2  ;;  %1161 = vmatprep.mubr.msk.f32.mxu1 %vm37_vm0, %v1482_v56 }
 0x176   :  { %v1493_v58 = vpop.eup %1220  ;;  %1179 = vmatprep.subr.mxu1 %v186_v2 }
 0x177   :  { %1180 = vmatpush3.msra.mxu1 %v186_v2 }
 0x178   :  { %350 = vrot.lane.b32.xlu1 %v1470_v53, %s1310_s2  ;;  %1162 = vmatmul.mubr.msk.f32.gmra.mxu1 %vm37_vm0, %v1493_v58 }
 0x179   :  { %673 = vrot.lane.b32.xlu0 %v648_v57, %s1311_s1  ;;  %1181 = vmatprep.subr.mxu1 %v185_v3 }
 0x17a   :  { %1182 = vmatpush3.msra.mxu1 %v185_v3 }
 0x17c   :  { %356 = vrot.lane.b32.xlu1 %v1493_v58, %s1310_s2 }
 0x17d   :  { %738 = vrot.lane.b32.xlu0 %v648_v57, %s1312_s9 }
 0x180   :  { %675 = vrot.lane.b32.xlu1 %v649_v59, %s1311_s1 }
 0x181   :  { %677 = vrot.lane.b32.xlu0 %v650_v60, %s1311_s1 }
 0x184   :  { %740 = vrot.lane.b32.xlu1 %v649_v59, %s1312_s9 }
 0x185   :  { %679 = vrot.lane.b32.xlu0 %v651_v61, %s1311_s1 }
 0x188   :  { %742 = vrot.lane.b32.xlu1 %v650_v60, %s1312_s9 }
 0x189   :  { %681 = vrot.lane.b32.xlu0 %v652_v62, %s1311_s1 }
 0x18c   :  { %744 = vrot.lane.b32.xlu1 %v651_v61, %s1312_s9 }
 0x18d   :  { %582 = vrot.lane.b32.xlu0 %v1417_v27, %s1313_s10 }
 0x190   :  { %746 = vrot.lane.b32.xlu1 %v652_v62, %s1312_s9 }
 0x194   :  { %584 = vrot.lane.b32.xlu1 %v1427_v29, %s1313_s10 }
 0x198   :  { %586 = vrot.lane.b32.xlu1 %v1432_v30, %s1313_s10 }
 0x1dd   :  { %v347_v4 = vpop.permute.xlu0 %346 }
 0x1de   :  { %v365_v5 = vsel %vm364_vm2, %v347_v4, 0.0 }
 0x1df   :  { %366 = vadd.xlane.f32.xlu0 %v365_v5 }
 0x1e2   :  { %v349_v6 = vpop.permute.xlu1 %348 }
 0x1e3   :  { %v368_v36 = vsel %vm364_vm2, %v349_v6, 0.0 }
 0x1e6   :  { %v353_v7 = vpop.permute.xlu1 %352 }
 0x1e7   :  { %v355_v8 = vpop.permute.xlu0 %354  ;;  %v374_v9 = vsel %vm364_vm2, %v353_v7, 0.0 }
 0x1e8   :  { %375 = vadd.xlane.f32.xlu0 %v374_v9  ;;  %v377_v14 = vsel %vm364_vm2, %v355_v8, 0.0 }
 0x1ea   :  { %v351_v10 = vpop.permute.xlu1 %350 }
 0x1eb   :  { %v674_v11 = vpop.permute.xlu0 %673  ;;  %v371_v12 = vsel %vm364_vm2, %v351_v10, 0.0 }
 0x1ec   :  { %v688_v13 = vsub.f32 %v1417_v27, %v674_v11  ;;  %372 = vadd.xlane.f32.xlu0 %v371_v12 }
 0x1ee   :  { %698 = vrot.lane.b32.xlu1 %v688_v13, %s1313_s10  ;;  %v357_v15 = vpop.permute.xlu1 %356 }
 0x1ef   :  { %v739_v19 = vpop.permute.xlu0 %738  ;;  %v380_v39 = vsel %vm364_vm2, %v357_v15, 0.0 }
 0x1f0   :  { %378 = vadd.xlane.f32.xlu0 %v377_v14  ;;  %v753_v41 = vadd.f32 %v739_v19, %v1417_v27 }
 0x1f2   :  { %v676_v18 = vpop.permute.xlu1 %675 }
 0x1f3   :  { %v689_v23 = vsub.f32 %v1427_v29, %v676_v18  ;;  %v678_v26 = vpop.permute.xlu0 %677 }
 0x1f4   :  { %v690_v33 = vsub.f32 %v1432_v30, %v678_v26 }
 0x1f6   :  { %v741_v24 = vpop.permute.xlu1 %740 }
 0x1f7   :  { %v754_v25 = vadd.f32 %v741_v24, %v1427_v29  ;;  %v680_v34 = vpop.permute.xlu0 %679 }
 0x1f8   :  { %v691_v43 = vsub.f32 %v1441_v31, %v680_v34 }
 0x1fa   :  { %v743_v28 = vpop.permute.xlu1 %742 }
 0x1fb   :  { %v682_v38 = vpop.permute.xlu0 %681  ;;  %v755_v42 = vadd.f32 %v743_v28, %v1432_v30 }
 0x1fc   :  { %v692_v40 = vsub.f32 %v1446_v32, %v682_v38 }
 0x1fe   :  { %v745_v35 = vpop.permute.xlu1 %744 }
 0x1ff   :  { %v756_v37 = vadd.f32 %v745_v35, %v1441_v31 }
 0x202   :  { %v747_v49 = vpop.permute.xlu1 %746 }
 0x206   :  { %700 = vrot.lane.b32.xlu0 %v689_v23, %s1313_s10 }
 0x20a   :  { %765 = vrot.lane.b32.xlu0 %v754_v25, %s1315_s17 }
 0x20e   :  { %702 = vrot.lane.b32.xlu0 %v690_v33, %s1313_s10 }
 0x212   :  { %369 = vadd.xlane.f32.xlu1 %v368_v36  ;;  %590 = vrot.lane.b32.xlu0 %v1446_v32, %s1313_s10 }
 0x216   :  { %381 = vadd.xlane.f32.xlu1 %v380_v39  ;;  %769 = vrot.lane.b32.xlu0 %v756_v37, %s1315_s17  ;;  %v1082_v37 = vmul.f32 -1.442695, %v1387_v16  ;;  %v1084_v39 = vmul.f32 -1.442695, %v1393_v20 }
 0x21a   :  { %706 = vrot.lane.b32.xlu0 %v692_v40, %s1313_s10 }
 0x21e   :  { %407 = vperm.xlu0 %1208, %v1417_v27  }
 0x222   :  { %422 = vperm.xlu0 %1208, %v1441_v31  }
 0x226   :  { %432 = vperm.xlu0 %1208, %v1459_v46  }
 0x227   :  { %763 = vrot.lane.b32.xlu1 %v753_v41, %s1315_s17  ;;  %v1612_v41 = vpop.permute.xlu0 %582 }
 0x22b   :  { %588 = vrot.lane.b32.xlu1 %v1441_v31, %s1313_s10  ;;  %v757_v31 = vadd.f32 %v747_v49, %v1446_v32 }
 0x22f   :  { %767 = vrot.lane.b32.xlu1 %v755_v42, %s1315_s17 }
 0x230   :  { %v1157_v44 = vpop.f32.mrf.mxu1 }
 0x231   :  { %v311_v45 = vmax.f32 %v1157_v44, 1e-30 }
 0x232   :  { %v281_v47 = vpop.f32.mrf.mxu1 }
 0x233   :  { %1222 = vrcp.f32 %v311_v45  ;;  %v310_v48 = vmax.f32 %v281_v47, 1e-30  ;;  %704 = vrot.lane.b32.xlu1 %v691_v43, %s1313_s10 }
 0x234   :  { %v1160_v27 = vpop.f32.mrf.mxu1 }
 0x235   :  { %1224 = vrcp.f32 %v310_v48  ;;  %v313_v50 = vmax.f32 %v1160_v27, 1e-30 }
 0x236   :  { %v291_v51 = vpop.f32.mrf.mxu1 }
 0x237   :  { %1226 = vrcp.f32 %v313_v50  ;;  %v312_v57 = vmax.f32 %v291_v51, 1e-30  ;;  %592 = vrot.lane.b32.xlu1 %v1459_v46, %s1313_s10 }
 0x238   :  { %v1163_v59 = vpop.f32.mrf.mxu1 }
 0x239   :  { %1228 = vrcp.f32 %v312_v57  ;;  %v315_v60 = vmax.f32 %v1163_v59, 1e-30 }
 0x23a   :  { %v301_v61 = vpop.f32.mrf.mxu1 }
 0x23b   :  { %1230 = vrcp.f32 %v315_v60  ;;  %v314_v62 = vmax.f32 %v301_v61, 1e-30  ;;  %771 = vrot.lane.b32.xlu1 %v757_v31, %s1315_s17  ;;  %v1085_v31 = vmul.f32 -1.442695, %v1395_v21 }
 0x23d   :  { %1232 = vrcp.f32 %v314_v62 }
 0x23e   :  { %1234 = vpow2.f32 %v1083_v0 }
 0x23f   :  { %412 = vperm.xlu1 %1209, %v1427_v29  }
 0x240   :  { %v1223_v63 = vpop.eup %1222 }
 0x241   :  { %v1561_v1 = vmul.f32 %v1223_v63, %v1472_v54 }
 0x242   :  { %v1225_v46 = vpop.eup %1224 }
 0x243   :  { %v329_v2 = vadd.f32 1e-06, %v1561_v1  ;;  %417 = vperm.xlu1 %1209, %v1432_v30   ;;  %v1566_v3 = vmul.f32 %v1225_v46, %v1464_v52 }
 0x244   :  { %v1227_v4 = vpop.eup %1226 }
 0x245   :  { %v328_v5 = vadd.f32 1e-06, %v1566_v3  ;;  %v1570_v29 = vmul.f32 %v1227_v4, %v1480_v55  ;;  %1236 = vlog2.f32 %v329_v2  ;;  %v1086_v4 = vmul.f32 -1.442695, %v1399_v22 }
 0x246   :  { %v1229_v6 = vpop.eup %1228 }
 0x247   :  { %427 = vperm.xlu1 %1209, %v1446_v32   ;;  %1238 = vlog2.f32 %v328_v5  ;;  %v1574_v17 = vmul.f32 %v1229_v6, %v1470_v53  ;;  %v331_v30 = vadd.f32 1e-06, %v1570_v29 }
 0x248   :  { %v1231_v7 = vpop.eup %1230 }
 0x249   :  { %v330_v8 = vadd.f32 1e-06, %v1574_v17  ;;  %v1579_v9 = vmul.f32 %v1231_v7, %v1493_v58  ;;  %1240 = vlog2.f32 %v331_v30  ;;  %v1617_v30 = vpop.permute.xlu1 %584 }
 0x24a   :  { %v1233_v10 = vpop.eup %1232 }
 0x24b   :  { %1242 = vlog2.f32 %v330_v8  ;;  %v1582_v11 = vmul.f32 %v1233_v10, %v1482_v56  ;;  %v333_v32 = vadd.f32 1e-06, %v1579_v9  ;;  %v1235_v13 = vpop.eup %1234 }
 0x24c   :  { %v634_v18 = vadd.f32 1.0, %v1235_v13 }
 0x24d   :  { %v332_v12 = vadd.f32 1e-06, %v1582_v11  ;;  %1244 = vlog2.f32 %v333_v32 }
 0x24f   :  { %1246 = vlog2.f32 %v332_v12 }
 0x250   :  { %1248 = vrcp.f32 %v634_v18  ;;  %v1620_v18 = vpop.permute.xlu1 %586 }
 0x251   :  { %1250 = vpow2.f32 %v1082_v37 }
 0x252   :  { %v1237_v14 = vpop.eup %1236  ;;  %1252 = vpow2.f32 %v1084_v39 }
 0x253   :  { %v1588_v23 = vmul.f32 0.6931472, %v1237_v14 }
 0x254   :  { %v1239_v15 = vpop.eup %1238 }
 0x255   :  { %v1586_v19 = vmul.f32 0.6931472, %v1239_v15 }
 0x256   :  { %v1241_v24 = vpop.eup %1240 }
 0x257   :  { %1183 = vmatprep.mubr.msk.f32.mxu1 %vm37_vm0, %v1586_v19  ;;  %v1596_v28 = vmul.f32 0.6931472, %v1241_v24 }
 0x258   :  { %v1243_v25 = vpop.eup %1242  ;;  %1184 = vmatmul.mubr.msk.f32.vlgmr.msra.gmra.mxu1 %vm37_vm0, %v1588_v23 }
 0x259   :  { %v1594_v26 = vmul.f32 0.6931472, %v1243_v25 }
 0x25a   :  { %v1245_v33 = vpop.eup %1244 }
 0x25b   :  { %1186 = vmatprep.mubr.msk.f32.mxu1 %vm37_vm0, %v1594_v26  ;;  %v1604_v36 = vmul.f32 0.6931472, %v1245_v33 }
 0x25c   :  { %v1247_v34 = vpop.eup %1246  ;;  %1187 = vmatmul.mubr.msk.f32.gmra.mxu1 %vm37_vm0, %v1596_v28 }
 0x25d   :  { %v1602_v35 = vmul.f32 0.6931472, %v1247_v34  ;;  %v1249_v38 = vpop.eup %1248 }
 0x25e   :  { %v719_v40 = vsub.f32 1.0, %v1249_v38  ;;  %v654_v42 = vadd.f32 1e-06, %v1249_v38  ;;  %v1251_v47 = vpop.eup %1250 }
 0x25f   :  { %1189 = vmatprep.mubr.msk.f32.mxu1 %vm37_vm0, %v1602_v35  ;;  %v633_v27 = vadd.f32 1.0, %v1251_v47  ;;  %v1253_v49 = vpop.eup %1252 }
 0x260   :  { %1190 = vmatmul.mubr.msk.f32.gmra.mxu1 %vm37_vm0, %v1604_v36  ;;  %v724_v43 = vadd.f32 1e-06, %v719_v40  ;;  %1254 = vlog2.f32 %v654_v42  ;;  %v635_v57 = vadd.f32 1.0, %v1253_v49  ;;  %v699_v39 = vpop.permute.xlu1 %698 }
 0x262   :  { %1256 = vlog2.f32 %v724_v43 }
 0x263   :  { %1258 = vrcp.f32 %v633_v27 }
 0x268   :  { %v367_v44 = vpop.xlane.xlu0 %366 }
 0x269   :  { %v383_v16 = vmax.f32 %v367_v44, 1e-30 }
 0x26b   :  { %1260 = vrcp.f32 %v383_v16 }
 0x26c   :  { %1262 = vrcp.f32 %v635_v57 }
 0x26d   :  { %v1255_v51 = vpop.eup %1254  ;;  %1264 = vpow2.f32 %v1085_v31 }
 0x26e   :  { %v661_v61 = vmul.f32 0.6931472, %v1255_v51 }
 0x26f   :  { %v1257_v20 = vpop.eup %1256 }
 0x270   :  { %v731_v62 = vmul.f32 0.6931472, %v1257_v20  ;;  %v1259_v5 = vpop.eup %1258 }
 0x271   :  { %v376_v45 = vpop.xlane.xlu0 %375  ;;  %v718_v21 = vsub.f32 1.0, %v1259_v5  ;;  %v653_v8 = vadd.f32 1e-06, %v1259_v5 }
 0x272   :  { %v386_v34 = vmax.f32 %v376_v45, 1e-30 }
 0x273   :  { %v723_v32 = vadd.f32 1e-06, %v718_v21 }
 0x275   :  { %v373_v48 = vpop.xlane.xlu0 %372 }
 0x276   :  { %v385_v60 = vmax.f32 %v373_v48, 1e-30 }
 0x278   :  { %1266 = vrcp.f32 %v385_v60  ;;  %v1261_v6 = vpop.eup %1260 }
 0x279   :  { %v379_v50 = vpop.xlane.xlu0 %378  ;;  %1268 = vpow2.f32 %v1086_v4  ;;  %v1263_v7 = vpop.eup %1262  ;;  %v390_v12 = vmul.f32 %v1261_v6, %v1464_v52 }
 0x27a   :  { %v1265_v10 = vpop.eup %1264  ;;  %v720_v14 = vsub.f32 1.0, %v1263_v7  ;;  %1270 = vlog2.f32 %v653_v8  ;;  %v655_v25 = vadd.f32 1e-06, %v1263_v7  ;;  %v387_v40 = vmax.f32 %v379_v50, 1e-30 }
 0x27b   :  { %v636_v15 = vadd.f32 1.0, %v1265_v10  ;;  %1272 = vlog2.f32 %v723_v32  ;;  %v564_v22 = vadd.f32 1e-06, %v390_v12 }
 0x27c   :  { %v725_v33 = vadd.f32 1e-06, %v720_v14 }
 0x27d   :  { %v701_v59 = vpop.permute.xlu0 %700  ;;  %1274 = vrcp.f32 %v636_v15 }
 0x27e   :  { %v714_v0 = vmul.f32 %v701_v59, %v661_v61  ;;  %1276 = vlog2.f32 %v564_v22 }
 0x27f   :  { %1278 = vlog2.f32 %v655_v25 }
 0x280   :  { %1280 = vlog2.f32 %v725_v33 }
 0x281   :  { %v766_v63 = vpop.permute.xlu0 %765  ;;  %1282 = vrcp.f32 %v386_v34 }
 0x282   :  { %v779_v46 = vmul.f32 %v766_v63, %v731_v62 }
 0x284   :  { %v784_v2 = vadd.f32 %v779_v46, %v714_v0 }
 0x285   :  { %v1267_v13 = vpop.eup %1266 }
 0x286   :  { %862 = vrot.lane.b32.xlu0 %v784_v2, %s1316_s18  ;;  %v394_v24 = vmul.f32 %v1267_v13, %v1470_v53  ;;  %v1269_v37 = vpop.eup %1268  ;;  %v703_v2 = vpop.permute.xlu0 %702 }
 0x287   :  { %v637_v52 = vadd.f32 1.0, %v1269_v37  ;;  %v1271_v44 = vpop.eup %1270 }
 0x288   :  { %v566_v38 = vadd.f32 1e-06, %v394_v24  ;;  %v1273_v53 = vpop.eup %1272  ;;  %v659_v27 = vmul.f32 0.6931472, %v1271_v44 }
 0x289   :  { %v729_v49 = vmul.f32 0.6931472, %v1273_v53 }
 0x28a   :  { %1284 = vlog2.f32 %v566_v38  ;;  %v1275_v45 = vpop.eup %1274  ;;  %v713_v57 = vmul.f32 %v699_v39, %v659_v27 }
 0x28b   :  { %1286 = vrcp.f32 %v387_v40  ;;  %v1277_v16 = vpop.eup %1276  ;;  %v721_v4 = vsub.f32 1.0, %v1275_v45  ;;  %v656_v13 = vadd.f32 1e-06, %v1275_v45 }
 0x28c   :  { %1288 = vrcp.f32 %v637_v52  ;;  %v1279_v51 = vpop.eup %1278  ;;  %v571_v61 = vmul.f32 0.6931472, %v1277_v16  ;;  %v591_v52 = vpop.permute.xlu0 %590 }
 0x28d   :  { %v1281_v31 = vpop.eup %1280  ;;  %v663_v46 = vmul.f32 0.6931472, %v1279_v51  ;;  %v726_v24 = vadd.f32 1e-06, %v721_v4 }
 0x28e   :  { %v1283_v59 = vpop.eup %1282  ;;  %v733_v6 = vmul.f32 0.6931472, %v1281_v31  ;;  %v600_v7 = vmul.f32 %v1612_v41, %v571_v61 }
 0x28f   :  { %v396_v21 = vmul.f32 %v1283_v59, %v1480_v55  ;;  %v715_v14 = vmul.f32 %v703_v2, %v663_v46 }
 0x291   :  { %v567_v33 = vadd.f32 1e-06, %v396_v21 }
 0x297   :  { %v1285_v62 = vpop.eup %1284 }
 0x298   :  { %v1287_v0 = vpop.eup %1286  ;;  %v575_v8 = vmul.f32 0.6931472, %v1285_v62 }
 0x299   :  { %v1289_v5 = vpop.eup %1288  ;;  %v398_v32 = vmul.f32 %v1287_v0, %v1482_v56 }
 0x29a   :  { %v722_v25 = vsub.f32 1.0, %v1289_v5  ;;  %v602_v55 = vmul.f32 %v1620_v18, %v575_v8  ;;  %v657_v40 = vadd.f32 1e-06, %v1289_v5 }
 0x29b   :  { %v370_v42 = vpop.xlane.xlu1 %369  ;;  %v568_v38 = vadd.f32 1e-06, %v398_v32 }
 0x29c   :  { %v384_v43 = vmax.f32 %v370_v42, 1e-30  ;;  %v727_v39 = vadd.f32 1e-06, %v722_v25 }
 0x29e   :  { %1290 = vrcp.f32 %v384_v43 }
 0x29f   :  { %v382_v47 = vpop.xlane.xlu1 %381 }
 0x2a0   :  { %v388_v48 = vmax.f32 %v382_v47, 1e-30 }
 0x2a2   :  { %1292 = vrcp.f32 %v388_v48 }
 0x2a3   :  { %v764_v50 = vpop.permute.xlu1 %763  ;;  %1294 = vlog2.f32 %v656_v13  ;;  %v1168_v13 = vpop.f32.mrf.mxu0 }
 0x2a4   :  { %v778_v20 = vmul.f32 %v764_v50, %v729_v49  ;;  %v770_v49 = vpop.permute.xlu0 %769 }
 0x2a6   :  { %v783_v60 = vadd.f32 %v778_v20, %v713_v57 }
 0x2a7   :  { %v589_v63 = vpop.permute.xlu1 %588 }
 0x2a8   :  { %860 = vrot.lane.b32.xlu1 %v783_v60, %s1316_s18 }
 0x2ab   :  { %v1291_v10 = vpop.eup %1290  ;;  %v768_v12 = vpop.permute.xlu1 %767 }
 0x2ac   :  { %v780_v15 = vmul.f32 %v768_v12, %v733_v6  ;;  %794 = vrot.lane.b32.xlu1 %v600_v7, %s1310_s2  ;;  %v392_v22 = vmul.f32 %v1291_v10, %v1472_v54  ;;  %v1068_v10 = vld [vmem:[%s1693_s4 + $0x48] ss:$0 sm:$0xff] }
 0x2ae   :  { %v785_v34 = vadd.f32 %v780_v15, %v715_v14  ;;  %v565_v37 = vadd.f32 1e-06, %v392_v22  ;;  %v1317_v14 = vmov 0.0  }
 0x2af   :  { %v1293_v41 = vpop.eup %1292  ;;  %v705_v18 = vpop.permute.xlu1 %704 }
 0x2b0   :  { %798 = vrot.lane.b32.xlu1 %v602_v55, %s1310_s2  ;;  %864 = vrot.lane.b32.xlu0 %v785_v34, %s1316_s18  ;;  %v400_v56 = vmul.f32 %v1293_v41, %v1493_v58  ;;  %1296 = vlog2.f32 %v565_v37  ;;  %v1295_v42 = vpop.eup %1294 }
 0x2b1   :  { %1298 = vlog2.f32 %v726_v24  ;;  %v665_v50 = vmul.f32 0.6931472, %v1295_v42  ;;  %v535_v24 = vpop.f32.mrf.mxu0 }
 0x2b2   :  { %1300 = vlog2.f32 %v567_v33  ;;  %v569_v54 = vadd.f32 1e-06, %v400_v56 }
 0x2b3   :  { %1302 = vlog2.f32 %v568_v38  ;;  %v593_v53 = vpop.permute.xlu1 %592  ;;  %v716_v60 = vmul.f32 %v705_v18, %v665_v50  ;;  %v1171_v55 = vpop.f32.mrf.mxu0 }
 0x2b4   :  { %1304 = vlog2.f32 %v569_v54 }
 0x2b5   :  { %1306 = vlog2.f32 %v727_v39  ;;  %v545_v39 = vpop.f32.mrf.mxu0 }
 0x2b6   :  { %1308 = vlog2.f32 %v657_v40 }
 0x2b7   :  { %v772_v62 = vpop.permute.xlu1 %771 }
 0x2bb   :  { %v413_v8 = vpop.permute.xlu1 %412 }
 0x2bc   :  { %vm436_vm3 = vcmp.eq.f32.partialorder %v1068_v10, %v413_v8  ;;  %v1009_v8 = vmul.f32 4.0, %v1588_v23 }
 0x2bd   :  { %v1297_v43 = vpop.eup %1296  ;;  %v1070_v15 = vsel %vm436_vm3, 1.0, %v1317_v14 }
 0x2be   :  { %v1299_v44 = vpop.eup %1298  ;;  %v573_v47 = vmul.f32 0.6931472, %v1297_v43  ;;  %v607_v34 = vmul.f32 %v1070_v15, %v1588_v23 }
 0x2bf   :  { %v1301_v48 = vpop.eup %1300  ;;  %v735_v20 = vmul.f32 0.6931472, %v1299_v44  ;;  %v418_v12 = vpop.permute.xlu1 %417 }
 0x2c0   :  { %v1303_v45 = vpop.eup %1302  ;;  %v601_v58 = vmul.f32 %v1617_v30, %v573_v47  ;;  %v577_v16 = vmul.f32 0.6931472, %v1301_v48  ;;  %v707_v30 = vpop.permute.xlu0 %706  ;;  %vm437_vm5 = vcmp.eq.f32.partialorder %v1068_v10, %v418_v12  ;;  %v613_v56 = vmul.f32 %v1168_v13, %v607_v34 }
 0x2c1   :  { %v1305_v27 = vpop.eup %1304  ;;  %v579_v31 = vmul.f32 0.6931472, %v1303_v45  ;;  %v781_v46 = vmul.f32 %v770_v49, %v735_v20  ;;  %v1071_v33 = vsel %vm437_vm5, 1.0, %v1317_v14 }
 0x2c2   :  { %v581_v51 = vmul.f32 0.6931472, %v1305_v27  ;;  %796 = vrot.lane.b32.xlu0 %v601_v58, %s1310_s2  ;;  %v1307_v57 = vpop.eup %1306  ;;  %v603_v59 = vmul.f32 %v589_v63, %v577_v16  ;;  %v608_v38 = vmul.f32 %v1071_v33, %v1594_v26  ;;  %v834_v44 = vsel %vm37_vm0, %v613_v56, 0.0 }
 0x2c3   :  { %v1309_v0 = vpop.eup %1308  ;;  %v737_v2 = vmul.f32 0.6931472, %v1307_v57  ;;  %v604_v4 = vmul.f32 %v591_v52, %v579_v31  ;;  %v786_v21 = vadd.f32 %v781_v46, %v716_v60  ;;  %v428_v37 = vpop.permute.xlu1 %427 }
 0x2c4   :  { %v605_v61 = vmul.f32 %v593_v53, %v581_v51  ;;  %v667_v5 = vmul.f32 0.6931472, %v1309_v0  ;;  %v408_v32 = vpop.permute.xlu0 %407  ;;  %vm439_vm7 = vcmp.eq.f32.partialorder %v1068_v10, %v428_v37  ;;  %v614_v18 = vmul.f32 %v608_v38, %v545_v39  ;;  %v1174_v53 = vpop.f32.mrf.mxu0 }
 0x2c5   :  { %v782_v6 = vmul.f32 %v772_v62, %v737_v2  ;;  %vm435_vm4 = vcmp.eq.f32.partialorder %v1068_v10, %v408_v32  ;;  %v1073_v42 = vsel %vm439_vm7, 1.0, %v1317_v14 }
 0x2c6   :  { %804 = vrot.lane.b32.xlu1 %v605_v61, %s1310_s2  ;;  %800 = vrot.lane.b32.xlu0 %v603_v59, %s1310_s2  ;;  %v717_v7 = vmul.f32 %v707_v30, %v667_v5  ;;  %v1069_v22 = vsel %vm435_vm4, 1.0, %v1317_v14  ;;  %v836_v48 = vsel %vm37_vm0, %v614_v18, 0.0  ;;  %v610_v45 = vmul.f32 %v1073_v42, %v1602_v35  ;;  %v555_v27 = vpop.f32.mrf.mxu0 }
 0x2c7   :  { %v606_v41 = vmul.f32 %v1069_v22, %v1586_v19  ;;  %v1011_v22 = vmul.f32 4.0, %v1596_v28 }
 0x2c8   :  { %v787_v63 = vadd.f32 %v782_v6, %v717_v7  ;;  %v423_v25 = vpop.permute.xlu0 %422  ;;  %v616_v51 = vmul.f32 %v610_v45, %v555_v27 }
 0x2c9   :  { %vm438_vm6 = vcmp.eq.f32.partialorder %v1068_v10, %v423_v25  ;;  %v612_v40 = vmul.f32 %v606_v41, %v535_v24 }
 0x2ca   :  { %802 = vrot.lane.b32.xlu1 %v604_v4, %s1310_s2  ;;  %866 = vrot.lane.b32.xlu0 %v786_v21, %s1316_s18  ;;  %v1072_v54 = vsel %vm438_vm6, 1.0, %v1317_v14  ;;  %v840_v59 = vsel %vm37_vm0, %v616_v51, 0.0  ;;  %v1008_v21 = vmul.f32 4.0, %v1586_v19 }
 0x2cb   :  { %v609_v43 = vmul.f32 %v1072_v54, %v1596_v28  ;;  %v833_v47 = vsel %vm37_vm0, %v612_v40, 0.0 }
 0x2cc   :  { %v433_v52 = vpop.permute.xlu0 %432  ;;  %v835_v58 = vadd.f32 %v834_v44, %v833_v47  ;;  %v1013_v44 = vmul.f32 4.0, %v1604_v36 }
 0x2cd   :  { %vm440_vm8 = vcmp.eq.f32.partialorder %v1068_v10, %v433_v52  ;;  %v615_v49 = vmul.f32 %v1171_v55, %v609_v43  ;;  %v1010_v10 = vmul.f32 4.0, %v1594_v26 }
 0x2ce   :  { %868 = vrot.lane.b32.xlu1 %v787_v63, %s1316_s18  ;;  %v1074_v16 = vsel %vm440_vm8, 1.0, %v1317_v14  ;;  %v837_v50 = vadd.f32 %v836_v48, %v835_v58 }
 0x2cf   :  { %v838_v57 = vsel %vm37_vm0, %v615_v49, 0.0  ;;  %v611_v20 = vmul.f32 %v1074_v16, %v1604_v36 }
 0x2d0   :  { %v839_v31 = vadd.f32 %v838_v57, %v837_v50 }
 0x2d1   :  { %v617_v60 = vmul.f32 %v1174_v53, %v611_v20 }
 0x2d2   :  { %v841_v61 = vadd.f32 %v840_v59, %v839_v31 }
 0x2d3   :  { %v842_v62 = vsel %vm37_vm0, %v617_v60, 0.0 }
 0x2d4   :  { %v843_v0 = vadd.f32 %v842_v62, %v841_v61 }
 0x2f2   :  { %844 = vadd.xlane.f32.xlu1 %v843_v0 }
 0x2f8   :  { %v863_v5 = vpop.permute.xlu0 %862 }
 0x2f9   :  { %v876_v48 = vsel %vm364_vm2, %v863_v5, 0.0 }
 0x318   :  { %v1185_v46 = vpop.f32.mrf.mxu1 }
 0x319   :  { %v1015_v12 = vsub.f32 %v1009_v8, %v1185_v46 }
 0x31a   :  { %v979_v2 = vpop.f32.mrf.mxu1  ;;  %v861_v30 = vpop.permute.xlu1 %860 }
 0x31b   :  { %v1014_v63 = vsub.f32 %v1008_v21, %v979_v2  ;;  %v1021_v33 = vmul.f32 %v1015_v12, %v1561_v1  ;;  %v875_v52 = vsel %vm364_vm2, %v861_v30, 0.0 }
 0x31c   :  { %v1188_v4 = vpop.f32.mrf.mxu1  ;;  %v877_v49 = vadd.f32 %v876_v48, %v875_v52 }
 0x31d   :  { %v1020_v15 = vmul.f32 %v1014_v63, %v1566_v3  ;;  %v1017_v41 = vsub.f32 %v1011_v22, %v1188_v4  ;;  %v1012_v3 = vmul.f32 4.0, %v1602_v35  ;;  %v1027_v1 = vsel %vm37_vm0, %v1021_v33, 0.0 }
 0x31e   :  { %v795_v6 = vpop.permute.xlu1 %794  ;;  %v989_v7 = vpop.f32.mrf.mxu1 }
 0x31f   :  { %v1016_v13 = vsub.f32 %v1010_v10, %v989_v7  ;;  %v812_v19 = vsel %vm364_vm2, %v795_v6, 0.0  ;;  %v1026_v37 = vsel %vm37_vm0, %v1020_v15, 0.0  ;;  %v1023_v42 = vmul.f32 %v1017_v41, %v1570_v29 }
 0x320   :  { %v1191_v14 = vpop.f32.mrf.mxu1  ;;  %v1028_v18 = vadd.f32 %v1027_v1, %v1026_v37 }
 0x321   :  { %v1022_v34 = vmul.f32 %v1016_v13, %v1574_v17  ;;  %v1031_v50 = vsel %vm37_vm0, %v1023_v42, 0.0  ;;  %v1019_v51 = vsub.f32 %v1013_v44, %v1191_v14 }
 0x322   :  { %v865_v32 = vpop.permute.xlu0 %864  ;;  %v799_v24 = vpop.permute.xlu1 %798 }
 0x323   :  { %v999_v55 = vpop.f32.mrf.mxu1  ;;  %v815_v38 = vsel %vm364_vm2, %v799_v24, 0.0  ;;  %v1029_v39 = vsel %vm37_vm0, %v1022_v34, 0.0  ;;  %v878_v45 = vsel %vm364_vm2, %v865_v32, 0.0  ;;  %v1025_v62 = vmul.f32 %v1019_v51, %v1579_v9 }
 0x324   :  { %v1018_v40 = vsub.f32 %v1012_v3, %v999_v55  ;;  %v1030_v43 = vadd.f32 %v1029_v39, %v1028_v18  ;;  %v879_v57 = vadd.f32 %v878_v45, %v877_v49 }
 0x325   :  { %v1035_v2 = vsel %vm37_vm0, %v1025_v62, 0.0 }
 0x326   :  { %v1024_v58 = vmul.f32 %v1018_v40, %v1582_v11  ;;  %v1032_v59 = vadd.f32 %v1031_v50, %v1030_v43 }
 0x328   :  { %v1033_v61 = vsel %vm37_vm0, %v1024_v58, 0.0 }
 0x329   :  { %v1034_v46 = vadd.f32 %v1033_v61, %v1032_v59 }
 0x32b   :  { %v1036_v30 = vadd.f32 %v1035_v2, %v1034_v46 }
 0x334   :  { %v797_v25 = vpop.permute.xlu0 %796 }
 0x335   :  { %v813_v23 = vsel %vm364_vm2, %v797_v25, 0.0 }
 0x336   :  { %v814_v26 = vadd.f32 %v813_v23, %v812_v19 }
 0x338   :  { %v805_v28 = vpop.permute.xlu1 %804  ;;  %v816_v56 = vadd.f32 %v815_v38, %v814_v26  ;;  %v801_v54 = vpop.permute.xlu0 %800 }
 0x339   :  { %v817_v17 = vsel %vm364_vm2, %v801_v54, 0.0  ;;  %v821_v29 = vsel %vm364_vm2, %v805_v28, 0.0 }
 0x33a   :  { %v818_v53 = vadd.f32 %v817_v17, %v816_v56 }
 0x33c   :  { %v803_v35 = vpop.permute.xlu1 %802  ;;  %v867_v47 = vpop.permute.xlu0 %866 }
 0x33d   :  { %v819_v27 = vsel %vm364_vm2, %v803_v35, 0.0  ;;  %v880_v36 = vsel %vm364_vm2, %v867_v47, 0.0 }
 0x33e   :  { %v820_v16 = vadd.f32 %v819_v27, %v818_v53  ;;  %v881_v11 = vadd.f32 %v880_v36, %v879_v57 }
 0x340   :  { %v869_v20 = vpop.permute.xlu1 %868  ;;  %v822_v31 = vadd.f32 %v821_v29, %v820_v16 }
 0x341   :  { %v882_v60 = vsel %vm364_vm2, %v869_v20, 0.0 }
 0x342   :  { %823 = vadd.xlane.f32.xlu0 %v822_v31  ;;  %v883_v0 = vadd.f32 %v882_v60, %v881_v11 }
 0x346   :  { %884 = vadd.xlane.f32.xlu0 %v883_v0 }
 0x34a   :  { %1037 = vadd.xlane.f32.xlu0 %v1036_v30 }
 0x37b   :  { %v845_v4 = vpop.xlane.xlu1 %844 }
 0x37c   :  { %v846_v5 = vrot.slane %v845_v4, 4 }
 0x37e   :  { %v847_v21 = vadd.f32 %v846_v5, %v845_v4 }
 0x380   :  { %v848_v6 = vrot.slane %v847_v21, 2 }
 0x382   :  { %v849_v10 = vadd.f32 %v848_v6, %v847_v21 }
 0x384   :  { %v850_v22 = vrot.slane %v849_v10, 1 }
 0x386   :  { %v851_v55 = vadd.f32 %v850_v22, %v849_v10 }
 0x3cb   :  { %v824_v7 = vpop.xlane.xlu0 %823 }
 0x3cc   :  { %v825_v8 = vrot.slane %v824_v7, 4 }
 0x3ce   :  { %v826_v63 = vadd.f32 %v825_v8, %v824_v7 }
 0x3cf   :  { %v885_v32 = vpop.xlane.xlu0 %884 }
 0x3d0   :  { %v827_v12 = vrot.slane %v826_v63, 2  ;;  %v886_v13 = vrot.slane %v885_v32, 4 }
 0x3d2   :  { %v887_v14 = vadd.f32 %v886_v13, %v885_v32  ;;  %v828_v9 = vadd.f32 %v827_v12, %v826_v63 }
 0x3d3   :  { %v1038_v15 = vpop.xlane.xlu0 %1037 }
 0x3d4   :  { %v888_v24 = vrot.slane %v887_v14, 2  ;;  %v1039_v25 = vrot.slane %v1038_v15, 4  ;;  %v829_v33 = vrot.slane %v828_v9, 1 }
 0x3d6   :  { %v1040_v19 = vadd.f32 %v1039_v25, %v1038_v15  ;;  %v830_v34 = vadd.f32 %v829_v33, %v828_v9  ;;  %v889_v23 = vadd.f32 %v888_v24, %v887_v14 }
 0x3d8   :  { %v1041_v26 = vrot.slane %v1040_v19, 2  ;;  %1192 = vpush %v830_v34  ;;  %v890_v37 = vrot.slane %v889_v23, 1 }
 0x3d9   :  { %1194 = vpush %v851_v55 }
 0x3da   :  { %v1042_v41 = vadd.f32 %v1041_v26, %v1040_v19  ;;  %v891_v38 = vadd.f32 %v890_v37, %v889_v23 }
 0x3dc   :  { %1196 = vpush %v891_v38  ;;  %v1043_v3 = vrot.slane %v1042_v41, 1 }
 0x3de   :  { %v1044_v28 = vadd.f32 %v1043_v3, %v1042_v41 }
 0x3e0   :  { %1198 = vpush %v1044_v28 }
 0x409   :  { %s1193_s4 = spop %1192 }
 0x40a   :  { %v832_v56 = vstv %s1193_s4  ;;  %s1195_s21 = spop %1194 }
 0x40b   :  { %v853_v54 = vstv %s1195_s21 }
 0x40c   :  { %v854_v1 = vadd.f32 %v853_v54, %v832_v56 }
 0x40d   :  { %s1197_s22 = spop %1196 }
 0x40e   :  { %v893_v39 = vstv %s1197_s22 }
 0x40f   :  { %v894_v40 = vadd.f32 %v893_v39, %v854_v1 }
 0x411   :  { %1048 = vst.msk [vmem:[%s1695_s5] sm:$0x1] %vm1047_vm9, %v894_v40  ;;  %s1199_s25 = spop %1198 }
 0x412   :  { %v1046_v17 = vstv %s1199_s25 }
 0x413   :  { %1050 = vst.msk [vmem:[%s1695_s5] sm:$0x1] %vm1049_vm10, %v1046_v17 }

</bundles_post_ra>
